<compile_context>
chip_gen: v5e
topology: v5e:2x2
jax: 0.10.0
libtpu: 0.0.40
codegen_flags: <defaults>
</compile_context>

<pallas_src>
import functools

import jax
import jax.numpy as jnp
from jax import lax
from jax.experimental import pallas as pl
from jax.experimental.pallas import tpu as pltpu


def _round_up(x, m):
    return (x + m - 1) // m * m


# ---------------------------------------------------------------------------
# One-time weight precompute (module-init analogue): fold the 1/sqrt(D) scale
# into W_q, pad each head to a 128-lane boundary, lay out as [Q heads|K heads|V heads].
# ---------------------------------------------------------------------------
def prepare_fused_qkv_weights(wq, wk, wv):
    """wq/wk/wv: (H, d_in, D) f32  ->  (d_in, 3*H*Dp) bf16, Dp = round_up(D, 128)."""
    H, d_in, D = wq.shape
    Dp = _round_up(D, 128)
    scale = jnp.float32(1.0 / (D ** 0.5))

    def _flat(w):
        w = jnp.transpose(w, (1, 0, 2))                       # (d_in, H, D)
        w = jnp.pad(w, ((0, 0), (0, 0), (0, Dp - D)))         # lane-pad each head
        return w.reshape(d_in, H * Dp)

    w_qkv = jnp.concatenate([_flat(wq * scale), _flat(wk), _flat(wv)], axis=-1)
    return w_qkv.astype(jnp.bfloat16)                         # (d_in, 3*H*Dp)


# ---------------------------------------------------------------------------
# Kernel 1: fused QKV projection (all heads, one MXU matmul per tile).
# ---------------------------------------------------------------------------
def _qkv_proj_kernel(x_ref, w_ref, o_ref):
    # x_ref: (t_blk, d_in) bf16, w_ref: (d_in, 3*H*Dp) bf16, o_ref: (t_blk, 3*H*Dp) bf16
    o_ref[...] = jnp.dot(
        x_ref[...], w_ref[...], preferred_element_type=jnp.float32
    ).astype(o_ref.dtype)


# ---------------------------------------------------------------------------
# Kernel 2: flash-style causal attention, one (batch, head, q-block) per grid slice,
# online softmax over the kv axis.
# ---------------------------------------------------------------------------
def _flash_attn_kernel(q_ref, k_ref, v_ref, o_ref, m_ref, l_ref, acc_ref, *, t_blk):
    q_idx = pl.program_id(2)
    kv_idx = pl.program_id(3)

    @pl.when(kv_idx == 0)
    def _init():
        m_ref[...] = jnp.full_like(m_ref, -1e30)    # finite: no NaN on padded rows
        l_ref[...] = jnp.zeros_like(l_ref)
        acc_ref[...] = jnp.zeros_like(acc_ref)

    def _accumulate(apply_causal_mask):
        q = q_ref[...]                               # (t_blk, Dp) bf16 (scale in W_q)
        k = k_ref[...]                               # (t_blk, Dp) bf16
        v = v_ref[...]                               # (t_blk, Dp) bf16
        # q @ k^T via transposed-RHS contraction; bf16 operands, f32 accumulation.
        s = lax.dot_general(q, k, (((1,), (1,)), ((), ())),
                            preferred_element_type=jnp.float32)      # (t_blk, t_blk)
        if apply_causal_mask:
            # Only the diagonal block builds/applies the mask.  Padded key columns
            # (global col >= T) only occur here and satisfy col > row for every valid
            # query row, so they are masked by the same predicate.
            row = lax.broadcasted_iota(jnp.int32, s.shape, 0) + q_idx * t_blk
            col = lax.broadcasted_iota(jnp.int32, s.shape, 1) + kv_idx * t_blk
            s = jnp.where(col <= row, s, jnp.float32(-1e30))
        m_prev = m_ref[...]
        m_new = jnp.maximum(m_prev, jnp.max(s, axis=-1, keepdims=True))
        alpha = jnp.exp(m_prev - m_new)                               # f32 EUP
        p = jnp.exp(s - m_new)                                        # f32 EUP
        l_ref[...] = alpha * l_ref[...] + jnp.sum(p, axis=-1, keepdims=True)
        acc_ref[...] = alpha * acc_ref[...] + jnp.dot(
            p.astype(v.dtype), v, preferred_element_type=jnp.float32)
        m_ref[...] = m_new

    @pl.when(kv_idx < q_idx)          # fully below the diagonal: mask-free fast path
    def _full_block():
        _accumulate(apply_causal_mask=False)

    @pl.when(kv_idx == q_idx)         # diagonal block: mask + finalize (last causal block)
    def _diag_block():
        _accumulate(apply_causal_mask=True)
        # dropout(p=0.0) is identity (eval), so normalize and store directly.
        o_ref[...] = (acc_ref[...] *
                      pl.reciprocal(l_ref[...], approx=True)).astype(o_ref.dtype)


# ---------------------------------------------------------------------------
# Forward wrapper.
# ---------------------------------------------------------------------------
def multi_head_attention_wrapper(x, w_qkv, num_heads, head_out, *, block_t=256):
    """x: (B, T, d_in) f32; w_qkv: precomputed (d_in, 3*H*Dp) bf16 from
    prepare_fused_qkv_weights.  Returns (B, T, H*head_out) f32 ==
    torch.cat([CausalAttention_h(x) for h in heads], dim=-1)."""
    B, T, d_in = x.shape
    H, D = num_heads, head_out
    Dp = w_qkv.shape[1] // (3 * H)
    assert block_t % 8 == 0

    t_blk = min(block_t, _round_up(T, 8))
    t_pad = _round_up(T, t_blk)
    nq = t_pad // t_blk

    x_p = x
    if t_pad != T:
        x_p = jnp.pad(x, ((0, 0), (0, t_pad - T), (0, 0)))
    x_p = x_p.astype(jnp.bfloat16)                     # bf16 MXU operands

    vmem_limit = 32 * 1024 * 1024                      # tiles sized to fit v7x's 64 MiB

    # --- Kernel 1: fused QKV projection -> (B, t_pad, 3*H*Dp) bf16 ---
    qkv = pl.pallas_call(
        _qkv_proj_kernel,
        out_shape=jax.ShapeDtypeStruct((B, t_pad, 3 * H * Dp), jnp.bfloat16),
        grid_spec=pltpu.PrefetchScalarGridSpec(
            num_scalar_prefetch=0,
            grid=(B, nq),
            in_specs=[
                pl.BlockSpec((None, t_blk, d_in), lambda b, t: (b, t, 0)),
                pl.BlockSpec((d_in, 3 * H * Dp), lambda b, t: (0, 0)),
            ],
            out_specs=pl.BlockSpec((None, t_blk, 3 * H * Dp), lambda b, t: (b, t, 0)),
        ),
        compiler_params=pltpu.CompilerParams(
            dimension_semantics=("parallel", "parallel"),
            vmem_limit_bytes=vmem_limit),
    )(x_p, w_qkv)

    # --- Kernel 2: flash causal attention over lane-aligned per-head blocks ---
    kernel = functools.partial(_flash_attn_kernel, t_blk=t_blk)
    out_p = pl.pallas_call(
        kernel,
        out_shape=jax.ShapeDtypeStruct((B, t_pad, H * Dp), jnp.float32),
        grid_spec=pltpu.PrefetchScalarGridSpec(
            num_scalar_prefetch=0,
            grid=(B, H, nq, nq),
            in_specs=[
                # Q / K / V are column blocks of the same fused qkv array.
                pl.BlockSpec((None, t_blk, Dp), lambda b, h, qi, ki: (b, qi, h)),
                pl.BlockSpec((None, t_blk, Dp), lambda b, h, qi, ki: (b, ki, H + h)),
                pl.BlockSpec((None, t_blk, Dp), lambda b, h, qi, ki: (b, ki, 2 * H + h)),
            ],
            out_specs=pl.BlockSpec((None, t_blk, Dp), lambda b, h, qi, ki: (b, qi, h)),
            scratch_shapes=[
                pltpu.VMEM((t_blk, 1), jnp.float32),    # running max m
                pltpu.VMEM((t_blk, 1), jnp.float32),    # running denom l
                pltpu.VMEM((t_blk, Dp), jnp.float32),   # running context acc
            ],
        ),
        compiler_params=pltpu.CompilerParams(
            dimension_semantics=("parallel", "parallel", "parallel", "arbitrary"),
            vmem_limit_bytes=vmem_limit),
    )(qkv, qkv, qkv)

    # Strip sequence padding and per-head lane padding (XLA, negligible; zero-cost
    # when head_out is already a multiple of 128).
    out_p = out_p[:, :T, :]
    if Dp != D:
        out_p = out_p.reshape(B, T, H, Dp)[..., :D].reshape(B, T, H * D)
    return out_p


# ---------------------------------------------------------------------------
# Pure-JAX reference mirroring the PyTorch forward.
# ---------------------------------------------------------------------------
def _reference(x, wq, wk, wv):
    B, T, d_in = x.shape
    H, _, D = wq.shape
    outs = []
    mask = jnp.triu(jnp.ones((T, T), dtype=bool), k=1)
    for h in range(H):
        q = x @ wq[h]
        k = x @ wk[h]
        v = x @ wv[h]
        scores = q @ jnp.swapaxes(k, -1, -2)
        scores = jnp.where(mask, -jnp.inf, scores)
        w = jax.nn.softmax(scores / (D ** 0.5), axis=-1)
        outs.append(w @ v)
    return jnp.concatenate(outs, axis=-1)


if __name__ == "__main__":
    # Shapes consistent with the module: d_in=3, context_length=6, d_out=2, 2 heads, batch=2.
    B, T, D_IN, D_OUT, NUM_HEADS = 2, 6, 3, 2, 2

    key = jax.random.PRNGKey(0)
    kx, kq, kk, kv_ = jax.random.split(key, 4)

    x = jax.random.uniform(kx, (B, T, D_IN), dtype=jnp.float32)
    # nn.Linear(d_in, d_out, bias=False) per head, stored as (d_in, d_out): forward is x @ W.
    wq = jax.random.normal(kq, (NUM_HEADS, D_IN, D_OUT), jnp.float32) * 0.1
    wk = jax.random.normal(kk, (NUM_HEADS, D_IN, D_OUT), jnp.float32) * 0.1
    wv = jax.random.normal(kv_, (NUM_HEADS, D_IN, D_OUT), jnp.float32) * 0.1

    # One-time precompute (module-init analogue): relayout + scale fold + bf16 cast.
    w_qkv = prepare_fused_qkv_weights(wq, wk, wv)

    # Case 1: the toy shape from the spec (single q/kv block).
    out = multi_head_attention_wrapper(x, w_qkv, NUM_HEADS, D_OUT)
    out = jax.block_until_ready(out)
    ref = _reference(x, wq, wk, wv)
    assert out.shape == (B, T, NUM_HEADS * D_OUT), out.shape
    # Tolerance accounts for bf16 MXU operands and the EUP approximate reciprocal.
    assert jnp.allclose(out, ref, atol=2e-2, rtol=2e-2), "case1 mismatch vs reference"

    # Case 2: longer sequence with a small tile so the multi-block flash path
    # (causal block skipping, diagonal-only masking, seq padding) is exercised.
    T2 = 20
    x2 = jax.random.uniform(jax.random.PRNGKey(1), (B, T2, D_IN), dtype=jnp.float32)
    out2 = multi_head_attention_wrapper(x2, w_qkv, NUM_HEADS, D_OUT, block_t=8)
    out2 = jax.block_until_ready(out2)
    ref2 = _reference(x2, wq, wk, wv)
    assert out2.shape == (B, T2, NUM_HEADS * D_OUT), out2.shape
    assert jnp.allclose(out2, ref2, atol=2e-2, rtol=2e-2), "case2 mismatch vs reference"

    print("KERNEL_OK")
</pallas_src>

<mosaic_0001>
module attributes {stable_mosaic.version = 11 : i64} {
  func.func @_qkv_proj_kernel(%arg0: i32, %arg1: i32, %arg2: memref<1x8x3xbf16, #tpu.memory_space<vmem>>, %arg3: memref<3x768xbf16, #tpu.memory_space<vmem>>, %arg4: memref<1x8x768xbf16, #tpu.memory_space<vmem>>) attributes {dimension_semantics = [#tpu.dimension_semantics<parallel>, #tpu.dimension_semantics<parallel>], iteration_bounds = array<i64: 2, 1>, scalar_prefetch = 0 : i64, scratch_operands = 0 : i64, tpu.core_type = #tpu.core_type<tc>, window_params = [{transform_indices = @transform_0, window_bounds = array<i64: 1, 8, 3>}, {pipeline_mode = #tpu.pipeline_mode<synchronous>, transform_indices = @transform_1, window_bounds = array<i64: 3, 768>}, {transform_indices = @transform_2, window_bounds = array<i64: 1, 8, 768>}]} {
    %c0 = arith.constant 0 : index
    %c0_0 = arith.constant 0 : index
    %c0_1 = arith.constant 0 : index
    %0 = vector.load %arg2[%c0, %c0_0, %c0_1] : memref<1x8x3xbf16, #tpu.memory_space<vmem>>, vector<1x8x3xbf16>
    %1 = vector.shape_cast %0 : vector<1x8x3xbf16> to vector<8x3xbf16>
    %c0_2 = arith.constant 0 : index
    %c0_3 = arith.constant 0 : index
    %2 = vector.load %arg3[%c0_2, %c0_3] : memref<3x768xbf16, #tpu.memory_space<vmem>>, vector<3x768xbf16>
    %cst = arith.constant dense<0.000000e+00> : vector<8x768xf32>
    %3 = tpu.matmul %1, %2, %cst {dimension_numbers = #tpu.dot_dimension_numbers<[1], [0], [0], [1], [0, 0, 1, 1], [], []>} : vector<8x3xbf16>, vector<3x768xbf16>, vector<8x768xf32> -> vector<8x768xf32>
    %4 = arith.truncf %3 : vector<8x768xf32> to vector<8x768xbf16>
    %c0_4 = arith.constant 0 : index
    %c0_5 = arith.constant 0 : index
    %c0_6 = arith.constant 0 : index
    %5 = vector.load %arg4[%c0_4, %c0_5, %c0_6] : memref<1x8x768xbf16, #tpu.memory_space<vmem>>, vector<1x8x768xbf16>
    %6 = vector.shape_cast %5 : vector<1x8x768xbf16> to vector<8x768xbf16>
    %7 = vector.shape_cast %4 : vector<8x768xbf16> to vector<1x8x768xbf16>
    tpu.vector_store %arg4[%c0_4, %c0_5, %c0_6], %7 {strides = array<i32>} : memref<1x8x768xbf16, #tpu.memory_space<vmem>>, vector<1x8x768xbf16>,
    return
  }
  func.func @transform_0(%arg0: i32, %arg1: i32) -> (i32, i32, i32) {
    %c0_i32 = arith.constant 0 : i32
    %c0_i32_0 = arith.constant 0 : i32
    return %arg0, %arg1, %c0_i32 : i32, i32, i32
  }
  func.func @transform_1(%arg0: i32, %arg1: i32) -> (i32, i32) {
    %c0_i32 = arith.constant 0 : i32
    %c0_i32_0 = arith.constant 0 : i32
    %c0_i32_1 = arith.constant 0 : i32
    return %c0_i32, %c0_i32_0 : i32, i32
  }
  func.func @transform_2(%arg0: i32, %arg1: i32) -> (i32, i32, i32) {
    %c0_i32 = arith.constant 0 : i32
    %c0_i32_0 = arith.constant 0 : i32
    return %arg0, %arg1, %c0_i32 : i32, i32, i32
  }
}

</mosaic_0001>

<bundles_post_ra>
// kernel: tpu_custom_call.1
= control target key start
LH: loop header
LB: loop body
LE: loop exit
PB: predicated region body
PF: predicated region fallthrough
CT: control target
= control target key end

     0   :  { %7 = vsyncpa [#allocation3], 0  ;;  %s719_s0 = inlined_call_operand.vmem [shape: bf16[2,8,3], index: 0, kind: input, shape index: {}]   ;;  %s720_s1 = inlined_call_operand.hbm [shape: bf16[3,768], index: 1, kind: input, shape index: {}]   ;;  %s721_s2 = inlined_call_operand.hbm [shape: bf16[2,8,768], index: 2, kind: output, shape index: {}]  }
   0x1   :  { %8 = vsyncpa [#allocation4], 0 }
   0x2   :  { %10 = vsyncpa [#allocation4 + $0x1], 0  ;;  %s619_s9 = smov 0   ;;  %s621_s10 = smov 0  }
   0x3   :  { %s623_s11 = smov 0   ;;  %s625_s12 = smov 0  }
   0x4   :  { %s627_s13 = smov 0   ;;  %s629_s14 = smov 0  }
   0x5 LB: > { %s402_s15 = sadd.s32 4294967295, %s600_s14   ;;  %s403_s16 = sadd.s32 4294967294, %s600_s14   ;;  %s600_s14 = sphi %s629_s14, %s16_s14   ;;  %s596_s13 = sphi %s627_s13, %s728_s13   ;;  %s592_s12 = sphi %s625_s12, %s727_s12   ;;  %s588_s11 = sphi %s623_s11, %s726_s11   ;;  %s584_s10 = sphi %s621_s10, %s725_s10   ;;  %s580_s9 = sphi %s619_s9, %s724_s9  }
   0x6   : > { %s28_s17 = sadd.s32 1, %s596_s13  ;;  %s86_s18 = sadd.s32 1, %s588_s11 }
   0x7   : > { %p30_p0 = scmp.ge.s32.totalorder %s28_s17, 2  ;;  %p96_p1 = scmp.ne.s32.totalorder %s588_s11, %s584_s10 }
   0x8   : > { %p97_p2 = scmp.eq.s32.totalorder %s402_s15, 1  ;;  %p102_p3 = scmp.ne.s32.totalorder %s584_s10, %s580_s9 }
   0x9   : > { %s730_s17 = smov (%p30_p0, %s28_s17), 0  ;;  %p103_p5 = scmp.eq.s32.totalorder %s403_s16, 1 }
   0xa   : > { %p659_p4 = por %p97_p2, %p96_p1  ;;  %s81_s20 = ssub.s32 %s596_s13, %s730_s17 }
   0xb   : > { %p404_p6 = scmp.ge.s32.totalorder %s600_s14, 1  ;;  %p84_p7 = scmp.eq.s32.totalorder %s81_s20, 0 }
   0xc   : > { %p666_p8 = por %p103_p5, %p102_p3  ;;  %p110_p9 = scmp.lt.s32.totalorder %s600_s14, 3 }
   0xd   : > { %s672_s22 = scalar_select %p84_p7, %s588_s11, %s86_s18  }
   0xe   : > { %p111_p10 = pnand %p404_p6, %p110_p9  ;;  %p435_p11 = scmp.eq.s32.totalorder %s402_s15, 0 }
   0xf   : > { %s122_s25 = sshll.u32 %s720_s1, 4  ;;  %s602_s26 = smov [#allocation2]   ;;  %s123_s25 = int_to_ptr.hbm [resolvable:$true] %s122_s25 }
  0x10   : > { %p427_p12 = pneg %p111_p10  ;;  %s124_s27 = sshll.u32 %s602_s26, 4  ;;  %s125_s27 = int_to_ptr.vmem [resolvable:$true] %s124_s27 }
  0x11   : > { %147 = sbr.rel (%p111_p10) target bundleno = 188 (0xbc), region = 28 }
  0x12   : > { %p428_p13 = pnand %p435_p11, %p427_p12 }
  0x14   : > { %430 = dma.hbm_to_vmem [thread:$0]  (!%p428_p13), %s123_s25, 192, %s125_s27, [#allocation3]  }
  0x16   : > { %571 = dma.done.wait (%p435_p11), [#allocation3], 192  }
  0x17   : > { %573 = vsyncadd (%p435_p11), [#allocation3], 4294967104  ;;  %p172_p0 = scmp.lt.s32.totalorder %s592_s12, 1  ;;  %v181_v0 = vld [vmem:[#allocation2] sm:$0xff]  ;;  %vm198_vm0 = vcmask 1040384   ;;  %vm199_vm1 = vcmask 1041408  }
  0x18   : > { %v182_v1 = vld [vmem:[#allocation2 + $0x8] sm:$0xf]  ;;  %184 = vst [vmem:[#allocation1] ss:$4 sm:$0xff] %v181_v0  ;;  %v603_v2 = vmov 65535   ;;  %vm194_vm2 = vcmask 23552  }
  0x19   : > { %s173_s28 = scalar_select %p172_p0, %s592_s12, 1  ;;  %187 = vst [vmem:[#allocation1 + $0x20] ss:$4 sm:$0xff] %v182_v1  ;;  %v200_v3 = vsel %vm198_vm0, 4294967295, %v603_v2 }
  0x1a   : > { %v201_v4 = vsel %vm199_vm1, %v200_v3, 0  ;;  %s169_s5 = sand.u32 1, %s584_s10   ;;  %s420_s8 = smul.u32 24, %s592_s12 }
  0x1b   : > { %s409_s29 = sshll.u32 %s173_s28, 2  ;;  %s419_s6 = smul.u32 24, %s169_s5 }
  0x1c   : > { %s178_s4 = scalar_lea.vmem %s719_s0, %s409_s29  ;;  %s312_s18 = scalar_lea.hbm %s721_s2, %s420_s8 }
  0x1d   : > { %v180_v15 = vld [vmem:[%s178_s4] sm:$0xf]  ;;  %s171_s7 = scalar_lea.vmem [#allocation5], %s419_s6  ;;  %s316_s23 = sshll.u32 %s312_s18, 4  ;;  %s317_s23 = int_to_ptr.hbm [resolvable:$true] %s316_s23 }
  0x1e   : > { %s314_s20 = sshll.u32 %s171_s7, 4  ;;  %s299_s12 = scalar_lea.sflag [#allocation4], %s169_s5  ;;  %s315_s20 = int_to_ptr.vmem [resolvable:$true] %s314_s20 }
  0x1f   : > { %v188_v5 = vld.sshfl [vmem:[#allocation1] sm:$0xff pattern:$0x73625140]  ;;  %v189_v6 = vld.sshfl [vmem:[#allocation1 + $0x8] sm:$0xff pattern:$0x73625140] }
  0x20   : > { %v202_v7 = vand.u32 %v201_v4, %v188_v5  ;;  %v204_v8 = vand.u32 %v201_v4, %v189_v6  ;;  %v190_v9 = vld.sshfl [vmem:[#allocation1 + $0x10] sm:$0xff pattern:$0x73625140]  ;;  %v191_v10 = vld.sshfl [vmem:[#allocation1 + $0x18] sm:$0xff pattern:$0x73625140] }
  0x21   : > { %v206_v11 = vand.u32 %v201_v4, %v190_v9  ;;  %v208_v12 = vand.u32 %v201_v4, %v191_v10  ;;  %v192_v13 = vld.sshfl [vmem:[#allocation1 + $0x20] sm:$0xff pattern:$0x73625140]  ;;  %v193_v14 = vld.sshfl [vmem:[#allocation1 + $0x28] sm:$0xff pattern:$0x73625140] }
  0x22   : > { %221 = vmatpush.bf16.msra.mxu0 %v202_v7  ;;  %234 = vmatpush.bf16.msra.mxu1 %v204_v8  ;;  %v210_v16 = vand.u32 %v201_v4, %v192_v13  ;;  %v212_v17 = vand.u32 %v201_v4, %v193_v14  ;;  %s532_s24 = sshra.s32 %s317_s23, 4  ;;  %s538_s28 = scalar_lea.hbm %s721_s2, 48  ;;  %s533_s24 = int_to_ptr.hbm [resolvable:$true] %s532_s24 }
  0x23   : > { %247 = vmatpush.bf16.msra.mxu2 %v206_v11  ;;  %260 = vmatpush.bf16.msra.mxu3 %v208_v12  ;;  %s534_s25 = scalar_lea.hbm %s533_s24, 24  ;;  %p539_p5 = scmp.lt.s32.totalorder %s533_s24, %s721_s2 }
  0x24   : > { %p535_p1 = scmp.ne.s32.totalorder %s533_s24, %s534_s25  ;;  %p540_p6 = scmp.lt.s32.totalorder %s538_s28, %s534_s25 }
  0x25   : > { %410 = vmatmul.msk.bf16.vlgmr.msra.gmra.mxu0 %vm194_vm2, %v180_v15  ;;  %411 = vmatmul.msk.bf16.vlgmr.msra.gmra.mxu1 %vm194_vm2, %v180_v15 }
  0x26   : > { %273 = vmatpush.bf16.msrb.mxu0 %v210_v16  ;;  %286 = vmatpush.bf16.msrb.mxu1 %v212_v17  ;;  %p536_p2 = pnand %p535_p1, %p659_p4  ;;  %p541_p7 = por %p540_p6, %p539_p5 }
  0x27   : > { %412 = vmatmul.msk.bf16.vlgmr.msra.gmra.mxu2 %vm194_vm2, %v180_v15  ;;  %413 = vmatmul.msk.bf16.vlgmr.msra.gmra.mxu3 %vm194_vm2, %v180_v15 }
  0x28   : > { %p537_p3 = pneg %p536_p2 }
  0x2a   : > { %p542_p9 = pnand %p541_p7, %p537_p3 }
  0x35   : > { %414 = vmatmul.msk.bf16.vlgmr.msrb.gmra.mxu0 %vm194_vm2, %v180_v15  ;;  %415 = vmatmul.msk.bf16.vlgmr.msrb.gmra.mxu1 %vm194_vm2, %v180_v15 }
  0xa2   : > { %v223_v18 = vpop.f32.mrf.mxu0  ;;  %v236_v19 = vpop.f32.mrf.mxu1 }
  0xa3   : > { %v292_v20 = vpack.c.bf16 %v236_v19, %v223_v18 }
  0xa5   : > { %295 = vst [vmem:[%s171_s7] sm:$0xff] %v292_v20 }
  0xaa   : > { %v249_v21 = vpop.f32.mrf.mxu2  ;;  %v262_v22 = vpop.f32.mrf.mxu3 }
  0xab   : > { %v225_v23 = vpop.f32.mrf.mxu0  ;;  %v238_v24 = vpop.f32.mrf.mxu1  ;;  %v293_v25 = vpack.c.bf16 %v262_v22, %v249_v21 }
  0xad   : > { %296 = vst [vmem:[%s171_s7 + $0x8] sm:$0xff] %v293_v25 }
  0xb2   : > { %v251_v26 = vpop.f32.mrf.mxu2  ;;  %v264_v27 = vpop.f32.mrf.mxu3 }
  0xb3   : > { %v275_v28 = vpop.f32.mrf.mxu0  ;;  %v288_v29 = vpop.f32.mrf.mxu1 }
  0xb4   : > { %v294_v30 = vpack.c.bf16 %v288_v29, %v275_v28 }
  0xb6   : > { %297 = vst [vmem:[%s171_s7 + $0x10] sm:$0xff] %v294_v30 }
  0xb7   : > { %545 = shalt.err (!%p542_p9)
}
  0xb8   : > { %425 = dma.vmem_to_hbm [thread:$0]  (%p659_p4), %s315_s20, 384, %s317_s23, %s299_s12  }
  0xbb   : > { %v277_v31 = vpop.f32.mrf.mxu0  ;;  %v290_v32 = vpop.f32.mrf.mxu1 }
  0xbc PF: > { %p437_p10 = scmp.ge.s32.totalorder %s600_s14, 2  ;;  %s328_s3 = sand.u32 1, %s580_s9  }
  0xbd   : > { %s329_s4 = scalar_lea.sflag [#allocation4], %s328_s3 }
  0xbe   : > { %p432_p11 = pnand %p437_p10, %p666_p8 }
  0xc0   : > { %p433_p12 = pneg %p432_p11 }
  0xc2   : > { %575 = dma.done.wait (%p433_p12), %s329_s4, 384  }
  0xc3   : > { %577 = vsyncadd (%p433_p12), %s329_s4, 4294966912  ;;  %s16_s14 = sadd.s32 1, %s600_s14   ;;  %s724_s9 = smov %s584_s10 }
  0xc4   : > { %p13_p13 = scmp.ge.s32.totalorder %s16_s14, 4   ;;  %s725_s10 = smov %s588_s11 }
  0xc5   : > { %s726_s11 = smov %s672_s22  ;;  %s727_s12 = smov %s596_s13 }
  0xc6   : > { %s728_s13 = smov %s730_s17  ;;  %15 = sbr.rel (!%p13_p13) target bundleno = 5 (0x5), region = 69 }
  0xcb   :  { %335 = vsyncpa [#allocation3], 1 }
  0xcc   :  { %337 = vsyncpa [#allocation3 + $0x1], 1 }
  0xcd   :  { %338 = vsyncpa [#allocation4], 1 }
  0xce   :  { %340 = vsyncpa [#allocation4 + $0x1], 1 }

</bundles_post_ra>
